<compile_context>
chip_gen: v6e
topology: v6e:2x2x1
jax: 0.10.0
libtpu: 0.0.40
codegen_flags: <defaults>
</compile_context>

<pallas_src>
import functools

import jax
import jax.numpy as jnp
from jax.experimental import pallas as pl
from jax.experimental.pallas import tpu as pltpu

EPS = 1e-5


def get_padding(kernel_size, stride=2, dilation=1):
    effective_kernel = dilation * (kernel_size - 1) + 1
    return (stride - 1 + effective_kernel - 1) // 2


def _silu(x):
    return x * jax.nn.sigmoid(x)


def _polyphase_taps(k, pad, stride=2):
    # ConvTranspose1d(stride=2, padding=pad):  out[2q + r] = sum_j w[j] * in[q - delta]
    # with j = r + pad + 2*delta.  Returns, per output phase r, the list of (j, delta).
    taps = []
    for r in range(stride):
        ph = []
        for j in range(k):
            if (j - r - pad) % stride == 0:
                ph.append((j, (j - r - pad) // stride))
        taps.append(tuple(ph))
    return tuple(taps)


# ------------------------------ fused Pallas kernel ------------------------------

def _fused_kernel(x_ref, wexp_ref, wdw_ref, se1_ref, se2_ref, wpw_ref, wsc_ref,
                  bias_ref, out_ref, *, taps, deltas, pad_l, pad_r, lh, lh_pad, l_out):
    f32 = jnp.float32
    bf16 = jnp.bfloat16
    rows_mid = wexp_ref.shape[0]          # NB * C_mid
    rows_out = wpw_ref.shape[0]           # NB * C_out

    bias = bias_ref[...]                  # packed per-row BN shifts (one DMA)
    b1 = bias[0:rows_mid]
    b2 = bias[rows_mid:2 * rows_mid]
    b3 = bias[2 * rows_mid:2 * rows_mid + rows_out]
    bp = bias[2 * rows_mid + rows_out:2 * rows_mid + 2 * rows_out]

    def lane_pad(a):
        # Zero halo for the transposed convolutions, built in VMEM (no HBM pad pass).
        parts = []
        if pad_l:
            parts.append(jnp.zeros((a.shape[0], pad_l), a.dtype))
        parts.append(a)
        if pad_r:
            parts.append(jnp.zeros((a.shape[0], pad_r), a.dtype))
        return jnp.concatenate(parts, axis=-1) if len(parts) > 1 else a

    x_bf = x_ref[...]                     # (NB*Cin, L)   bf16 (MXU input)
    x_ext = lane_pad(x_bf.astype(f32))    # (NB*Cin, Lext) f32 (for halo slicing)

    # ---- expansion 1x1 conv (BN1 folded) + shift + SiLU ------------------------------
    h = jnp.dot(wexp_ref[...], x_bf, preferred_element_type=f32)   # (NB*Cmid, L)
    h = _silu(h + b1)
    h_ext = lane_pad(h)                                            # (NB*Cmid, Lext)

    # ---- depthwise stride-2 ConvTranspose1d (BN2 folded) + SiLU, polyphase (VPU) -----
    wdw = wdw_ref[...]                                             # (NB*Cmid, k) f32
    t_ph = []
    for r in range(2):
        acc = jnp.zeros((rows_mid, lh), f32)
        for (j, d) in taps[r]:
            acc = acc + wdw[:, j:j + 1] * h_ext[:, pad_l - d:pad_l - d + lh]
        t_ph.append(_silu(acc + b2))

    # ---- SE block: masked global mean -> FC1 -> SiLU -> FC2 -> sigmoid gate ----------
    n_odd = l_out // 2                                             # valid odd columns
    colh = jax.lax.broadcasted_iota(jnp.int32, (1, lh), 1)
    odd_mask = colh < n_odd
    s = (jnp.sum(t_ph[0], axis=1, keepdims=True)
         + jnp.sum(jnp.where(odd_mask, t_ph[1], 0.0), axis=1, keepdims=True))
    m = s * (1.0 / l_out)                                              # (NB*Cmid, 1)
    s1 = _silu(jnp.dot(se1_ref[...], m, preferred_element_type=f32))   # (NB*red, 1)
    gate = jax.nn.sigmoid(jnp.dot(se2_ref[...], s1, preferred_element_type=f32))

    # ---- pointwise projection (BN3 folded) + SiLU: ONE dot over both phases ----------
    t_cat = jnp.concatenate([t_ph[0] * gate, t_ph[1] * gate], axis=-1)  # (NB*Cmid, 2*lh)
    u = jnp.dot(wpw_ref[...], t_cat.astype(bf16), preferred_element_type=f32)
    u = _silu(u + b3)                                                   # (NB*Cout, 2*lh)

    # ---- ConvTranspose1d shortcut (BNp folded) + SiLU: ONE dot, taps+phases fused ----
    stk = jnp.concatenate(
        [x_ext[:, pad_l - d:pad_l - d + lh] for d in deltas], axis=0).astype(bf16)
    p = jnp.dot(wsc_ref[...], stk, preferred_element_type=f32)          # (2*NB*Cout, lh)
    p0 = _silu(p[:rows_out] + bp)
    p1 = _silu(p[rows_out:] + bp)

    res_e = u[:, :lh] + p0
    res_o = jnp.where(odd_mask, u[:, lh:] + p1, 0.0)

    # Pack both phases into one 128-aligned slab -> single unmasked lane-dense store.
    parts = [res_e]
    if lh_pad > lh:
        parts.append(jnp.zeros((rows_out, lh_pad - lh), f32))
    parts.append(res_o)
    if lh_pad > lh:
        parts.append(jnp.zeros((rows_out, lh_pad - lh), f32))
    out_ref[...] = jnp.concatenate(parts, axis=-1).astype(out_ref.dtype)


# ------------------------------ wrapper ------------------------------

def _pick_nb(b, c_in, c_out):
    # Batch samples per grid step: block rows must be a multiple of 8 (sublane tile)
    # unless the block covers the full array.
    for nb in (8, 4, 2):
        if b % nb == 0 and (nb * c_in) % 8 == 0 and (nb * c_out) % 8 == 0:
            return nb
    if c_in % 8 == 0 and c_out % 8 == 0:
        return 1
    return b     # whole batch per step: full-array blocks are always legal


def transpose_efficientnet_block(x, params, *, kernel_size, stride=2):
    assert stride == 2, "polyphase formulation here is specialized to stride=2"
    b, c_in, l = x.shape
    k = kernel_size
    pad = get_padding(k, stride)
    l_out = (l - 1) * stride - 2 * pad + k
    lh = (l_out + 1) // 2                              # per-phase output length
    lh_pad = ((lh + 127) // 128) * 128                 # lane-dense store width
    taps = _polyphase_taps(k, pad, stride)
    deltas = sorted({d for ph in taps for (_, d) in ph})
    pad_l = max(max(deltas), 0)
    pad_r = max(lh - min(deltas) - l, 0)
    lext = pad_l + l + pad_r

    c_mid = params["w_exp"].shape[0]
    c_out = params["w_pw"].shape[0]
    red = params["se1"].shape[0]

    nb = _pick_nb(b, c_in, c_out)
    nsteps = b // nb

    f32, bf16 = jnp.float32, jnp.bfloat16
    eye = jnp.eye(nb, dtype=f32)
    bd = lambda w: jnp.kron(eye, w)                    # block-diagonal over NB batches

    w_exp_bd = bd(params["w_exp"]).astype(bf16)        # (nb*mid, nb*in)
    w_pw_bd = bd(params["w_pw"]).astype(bf16)          # (nb*out, nb*mid)
    se1_bd = bd(params["se1"])                         # (nb*red, nb*mid)   f32 (tiny)
    se2_bd = bd(params["se2"])                         # (nb*mid, nb*red)   f32 (tiny)
    w_dw_t = jnp.tile(params["w_dw"], (nb, 1))         # (nb*mid, k)        f32 (VPU)

    # Shortcut weight: rows = [phase0 | phase1] x (nb*out); cols = delta-major stacked x.
    zero_blk = jnp.zeros((nb * c_out, nb * c_in), f32)
    phase_rows = []
    for r in range(2):
        j_of = {d: j for (j, d) in taps[r]}
        phase_rows.append(jnp.concatenate(
            [bd(params["w_ps"][j_of[d]]) if d in j_of else zero_blk for d in deltas],
            axis=1))
    w_sc = jnp.concatenate(phase_rows, axis=0).astype(bf16)   # (2*nb*out, nd*nb*in)

    tile_col = lambda v: jnp.tile(v, (nb,)).reshape(-1, 1)
    bias = jnp.concatenate([tile_col(params["b1"]), tile_col(params["b2"]),
                            tile_col(params["b3"]), tile_col(params["bp"])], axis=0)

    x2d = x.reshape(b * c_in, l).astype(bf16)          # bf16 at the DMA boundary

    kernel = functools.partial(_fused_kernel, taps=taps, deltas=tuple(deltas),
                               pad_l=pad_l, pad_r=pad_r, lh=lh, lh_pad=lh_pad,
                               l_out=l_out)

    # Per-step VMEM working set (I/O double-buffered + in-kernel temporaries); derive
    # the limit explicitly since v7x only has 64 MiB physical VMEM.
    nd = len(deltas)
    w_bytes = ((w_exp_bd.size + w_pw_bd.size + w_sc.size) * 2
               + (se1_bd.size + se2_bd.size + w_dw_t.size + bias.size) * 4)
    step_bytes = (2 * nb * c_in * l * 2 + 2 * nb * c_out * 2 * lh_pad * 4 + 2 * w_bytes
                  + nb * c_in * lext * 4 + nb * c_mid * (l + lext) * 4
                  + 4 * nb * c_mid * lh * 4 + nd * nb * c_in * lh * 4
                  + 4 * nb * c_out * 2 * lh_pad * 4)
    vmem_limit = int(min(64 << 20, max(16 << 20, 4 * step_bytes)))

    flops = 2 * b * (c_mid * c_in * l + c_mid * k * lh + 2 * c_mid * red
                     + 2 * c_out * c_mid * lh + c_out * c_in * k * lh)
    transc = b * (c_mid * l + 2 * c_mid * lh + 4 * c_out * lh + c_mid + red)
    bytes_acc = x2d.size * 2 + b * c_out * 2 * lh_pad * 4 + w_bytes

    out2d = pl.pallas_call(
        kernel,
        out_shape=jax.ShapeDtypeStruct((b * c_out, 2 * lh_pad), f32),
        grid=(nsteps,),
        in_specs=[
            pl.BlockSpec((nb * c_in, l), lambda i: (i, 0)),
            pl.BlockSpec(w_exp_bd.shape, lambda i: (0, 0)),
            pl.BlockSpec(w_dw_t.shape, lambda i: (0, 0)),
            pl.BlockSpec(se1_bd.shape, lambda i: (0, 0)),
            pl.BlockSpec(se2_bd.shape, lambda i: (0, 0)),
            pl.BlockSpec(w_pw_bd.shape, lambda i: (0, 0)),
            pl.BlockSpec(w_sc.shape, lambda i: (0, 0)),
            pl.BlockSpec(bias.shape, lambda i: (0, 0)),
        ],
        out_specs=pl.BlockSpec((nb * c_out, 2 * lh_pad), lambda i: (i, 0)),
        compiler_params=pltpu.CompilerParams(
            dimension_semantics=("parallel",),
            vmem_limit_bytes=vmem_limit),
        cost_estimate=pl.CostEstimate(flops=int(flops), transcendentals=int(transc),
                                      bytes_accessed=int(bytes_acc)),
    )(x2d, w_exp_bd, w_dw_t, se1_bd, se2_bd, w_pw_bd, w_sc, bias)

    # Crop the lane padding and interleave the even/odd phases (tiny XLA epilogue).
    out = out2d.reshape(b, c_out, 2, lh_pad)[:, :, :, :lh]
    out = jnp.stack([out[:, :, 0, :], out[:, :, 1, :]], axis=-1).reshape(b, c_out, 2 * lh)
    return out[:, :, :l_out]


# ------------------------------ parameter init (BN folded) ------------------------------

def init_params(key, in_channels, out_channels, kernel_size, expansion_ratio,
                se_reduction_ratio=4):
    assert expansion_ratio > 1, "this implementation covers the expansion_ratio > 1 path"
    mid = in_channels * expansion_ratio
    red = mid // se_reduction_ratio
    k = kernel_size
    keys = jax.random.split(key, 22)

    def rn(kk, shape, scale=0.3):
        return scale * jax.random.normal(kk, shape, dtype=jnp.float32)

    def bn(ks, c):
        gamma = 1.0 + 0.1 * jax.random.normal(ks[0], (c,), dtype=jnp.float32)
        beta = 0.1 * jax.random.normal(ks[1], (c,), dtype=jnp.float32)
        mean = 0.1 * jax.random.normal(ks[2], (c,), dtype=jnp.float32)
        var = 1.0 + 0.1 * jax.random.uniform(ks[3], (c,), dtype=jnp.float32)
        scale = gamma / jnp.sqrt(var + EPS)
        return scale, beta - mean * scale

    w_exp = rn(keys[0], (mid, in_channels))                 # Conv1d(in, mid, 1)
    w_dw = rn(keys[1], (mid, k))                            # depthwise ConvT1d (mid,1,k)
    se_fc1 = rn(keys[2], (red, mid))                        # Linear(mid, red, bias=False)
    se_fc2 = rn(keys[3], (mid, red))                        # Linear(red, mid, bias=False)
    w_pw = rn(keys[4], (out_channels, mid))                 # Conv1d(mid, out, 1)
    w_pconv = rn(keys[5], (in_channels, out_channels, k))   # ConvTranspose1d(in, out, k)

    bn1_s, bn1_b = bn(keys[6:10], mid)
    bn2_s, bn2_b = bn(keys[10:14], mid)
    bn3_s, bn3_b = bn(keys[14:18], out_channels)
    bnp_s, bnp_b = bn(keys[18:22], out_channels)

    return dict(
        w_exp=w_exp * bn1_s[:, None],                                   # (mid, in)
        w_dw=w_dw * bn2_s[:, None],                                     # (mid, k)
        se1=se_fc1,                                                     # (red, mid)
        se2=se_fc2,                                                     # (mid, red)
        w_pw=w_pw * bn3_s[:, None],                                     # (out, mid)
        w_ps=jnp.transpose(w_pconv * bnp_s[None, :, None], (2, 1, 0)),  # (k, out, in)
        b1=bn1_b, b2=bn2_b, b3=bn3_b, bp=bnp_b)


# ------------------------------ pure-JAX reference ------------------------------

def _convT1d_ref(x, w_oik, stride, pad, groups=1):
    k = w_oik.shape[-1]
    return jax.lax.conv_general_dilated(
        x, w_oik[:, :, ::-1], window_strides=(1,),
        padding=[(k - 1 - pad, k - 1 - pad)], lhs_dilation=(stride,),
        dimension_numbers=("NCH", "OIH", "NCH"), feature_group_count=groups,
        precision=jax.lax.Precision.HIGHEST)


def reference_forward(x, params, *, kernel_size, stride=2):
    k = kernel_size
    pad = get_padding(k, stride)
    hi = jax.lax.Precision.HIGHEST
    rb = lambda a: a.astype(jnp.bfloat16).astype(jnp.float32)  # mirror kernel's bf16 MXU inputs
    xb = rb(x)
    mid = params["w_exp"].shape[0]
    h = _silu(jnp.einsum("oc,bcl->bol", rb(params["w_exp"]), xb, precision=hi)
              + params["b1"][None, :, None])
    t = _convT1d_ref(h, params["w_dw"][:, None, :], stride, pad, groups=mid)
    t = _silu(t + params["b2"][None, :, None])
    m = jnp.mean(t, axis=-1)
    s1 = _silu(m @ params["se1"].T)
    g = jax.nn.sigmoid(s1 @ params["se2"].T)
    ts = t * g[:, :, None]
    u = _silu(jnp.einsum("om,bml->bol", rb(params["w_pw"]), ts, precision=hi)
              + params["b3"][None, :, None])
    w_sc_oik = rb(jnp.transpose(params["w_ps"], (1, 2, 0)))    # (out, in, k)
    p = _silu(_convT1d_ref(xb, w_sc_oik, stride, pad) + params["bp"][None, :, None])
    return u + p


if __name__ == "__main__":
    key = jax.random.PRNGKey(0)
    kx, kp = jax.random.split(key)

    B, C_IN, L = 2, 4, 16
    C_OUT, K, EXPANSION = 8, 3, 4

    x = jax.random.normal(kx, (B, C_IN, L), dtype=jnp.float32)
    params = init_params(kp, C_IN, C_OUT, K, EXPANSION, se_reduction_ratio=4)

    out = transpose_efficientnet_block(x, params, kernel_size=K, stride=2)
    out = jax.block_until_ready(out)

    l_out = (L - 1) * 2 - 2 * get_padding(K, 2) + K
    assert out.shape == (B, C_OUT, l_out), out.shape
    assert bool(jnp.all(jnp.isfinite(out)))

    ref = reference_forward(x, params, kernel_size=K, stride=2)
    err = float(jnp.max(jnp.abs(out - ref)))
    assert err < 5e-2, f"max |kernel - reference| = {err}"
    print("KERNEL_OK")
</pallas_src>

<mosaic_0001>
module attributes {stable_mosaic.version = 11 : i64} {
  func.func @_fused_kernel(%arg0: i32, %arg1: memref<8x16xbf16, #tpu.memory_space<vmem>>, %arg2: memref<32x8xbf16, #tpu.memory_space<vmem>>, %arg3: memref<32x3xf32, #tpu.memory_space<vmem>>, %arg4: memref<8x32xf32, #tpu.memory_space<vmem>>, %arg5: memref<32x8xf32, #tpu.memory_space<vmem>>, %arg6: memref<16x32xbf16, #tpu.memory_space<vmem>>, %arg7: memref<32x16xbf16, #tpu.memory_space<vmem>>, %arg8: memref<96x1xf32, #tpu.memory_space<vmem>>, %arg9: memref<16x256xf32, #tpu.memory_space<vmem>>) attributes {dimension_semantics = [#tpu.dimension_semantics<parallel>], iteration_bounds = array<i64: 1>, scalar_prefetch = 0 : i64, scratch_operands = 0 : i64, tpu.core_type = #tpu.core_type<tc>, window_params = [{transform_indices = @transform_0, window_bounds = array<i64: 8, 16>}, {pipeline_mode = #tpu.pipeline_mode<synchronous>, transform_indices = @transform_1, window_bounds = array<i64: 32, 8>}, {pipeline_mode = #tpu.pipeline_mode<synchronous>, transform_indices = @transform_2, window_bounds = array<i64: 32, 3>}, {pipeline_mode = #tpu.pipeline_mode<synchronous>, transform_indices = @transform_3, window_bounds = array<i64: 8, 32>}, {pipeline_mode = #tpu.pipeline_mode<synchronous>, transform_indices = @transform_4, window_bounds = array<i64: 32, 8>}, {pipeline_mode = #tpu.pipeline_mode<synchronous>, transform_indices = @transform_5, window_bounds = array<i64: 16, 32>}, {pipeline_mode = #tpu.pipeline_mode<synchronous>, transform_indices = @transform_6, window_bounds = array<i64: 32, 16>}, {pipeline_mode = #tpu.pipeline_mode<synchronous>, transform_indices = @transform_7, window_bounds = array<i64: 96, 1>}, {transform_indices = @transform_8, window_bounds = array<i64: 16, 256>}]} {
    %c0 = arith.constant 0 : index
    %c0_0 = arith.constant 0 : index
    %0 = vector.load %arg8[%c0, %c0_0] : memref<96x1xf32, #tpu.memory_space<vmem>>, vector<96x1xf32>
    %1 = vector.extract_strided_slice %0 {offsets = [0, 0], sizes = [32, 1], strides = [1, 1]} : vector<96x1xf32> to vector<32x1xf32>
    %2 = vector.extract_strided_slice %0 {offsets = [32, 0], sizes = [32, 1], strides = [1, 1]} : vector<96x1xf32> to vector<32x1xf32>
    %3 = vector.extract_strided_slice %0 {offsets = [64, 0], sizes = [16, 1], strides = [1, 1]} : vector<96x1xf32> to vector<16x1xf32>
    %4 = vector.extract_strided_slice %0 {offsets = [80, 0], sizes = [16, 1], strides = [1, 1]} : vector<96x1xf32> to vector<16x1xf32>
    %c0_1 = arith.constant 0 : index
    %c0_2 = arith.constant 0 : index
    %5 = vector.load %arg1[%c0_1, %c0_2] : memref<8x16xbf16, #tpu.memory_space<vmem>>, vector<8x16xbf16>
    %6 = arith.extf %5 : vector<8x16xbf16> to vector<8x16xf32>
    %cst = arith.constant 0.000000e+00 : f32
    %7 = vector.broadcast %cst : f32 to vector<8x1xf32>
    %8 = tpu.concatenate %6, %7 in 1 : vector<8x16xf32>, vector<8x1xf32> -> vector<8x17xf32>
    %c0_3 = arith.constant 0 : index
    %c0_4 = arith.constant 0 : index
    %9 = vector.load %arg2[%c0_3, %c0_4] : memref<32x8xbf16, #tpu.memory_space<vmem>>, vector<32x8xbf16>
    %cst_5 = arith.constant dense<0.000000e+00> : vector<32x16xf32>
    %10 = tpu.matmul %9, %5, %cst_5 {dimension_numbers = #tpu.dot_dimension_numbers<[1], [0], [0], [1], [0, 0, 1, 1], [], []>} : vector<32x8xbf16>, vector<8x16xbf16>, vector<32x16xf32> -> vector<32x16xf32>
    %11 = vector.broadcast %1 : vector<32x1xf32> to vector<32x16xf32>
    %12 = arith.addf %10, %11 : vector<32x16xf32>
    %13 = arith.negf %12 : vector<32x16xf32>
    %14 = math.exp %13 : vector<32x16xf32>
    %cst_6 = arith.constant 1.000000e+00 : f32
    %15 = vector.broadcast %cst_6 : f32 to vector<32x16xf32>
    %16 = arith.addf %15, %14 : vector<32x16xf32>
    %17 = arith.divf %15, %16 : vector<32x16xf32>
    %18 = arith.mulf %12, %17 : vector<32x16xf32>
    %cst_7 = arith.constant 0.000000e+00 : f32
    %19 = vector.broadcast %cst_7 : f32 to vector<32x1xf32>
    %20 = tpu.concatenate %18, %19 in 1 : vector<32x16xf32>, vector<32x1xf32> -> vector<32x17xf32>
    %c0_8 = arith.constant 0 : index
    %c0_9 = arith.constant 0 : index
    %21 = vector.load %arg3[%c0_8, %c0_9] : memref<32x3xf32, #tpu.memory_space<vmem>>, vector<32x3xf32>
    %cst_10 = arith.constant 0.000000e+00 : f32
    %22 = vector.broadcast %cst_10 : f32 to vector<32x16xf32>
    %23 = vector.extract_strided_slice %21 {offsets = [0, 1], sizes = [32, 1], strides = [1, 1]} : vector<32x3xf32> to vector<32x1xf32>
    %24 = vector.extract_strided_slice %20 {offsets = [0, 0], sizes = [32, 16], strides = [1, 1]} : vector<32x17xf32> to vector<32x16xf32>
    %25 = vector.broadcast %23 : vector<32x1xf32> to vector<32x16xf32>
    %26 = arith.mulf %25, %24 : vector<32x16xf32>
    %27 = arith.addf %22, %26 : vector<32x16xf32>
    %28 = vector.broadcast %2 : vector<32x1xf32> to vector<32x16xf32>
    %29 = arith.addf %27, %28 : vector<32x16xf32>
    %30 = arith.negf %29 : vector<32x16xf32>
    %31 = math.exp %30 : vector<32x16xf32>
    %cst_11 = arith.constant 1.000000e+00 : f32
    %32 = vector.broadcast %cst_11 : f32 to vector<32x16xf32>
    %33 = arith.addf %32, %31 : vector<32x16xf32>
    %34 = arith.divf %32, %33 : vector<32x16xf32>
    %35 = arith.mulf %29, %34 : vector<32x16xf32>
    %cst_12 = arith.constant 0.000000e+00 : f32
    %36 = vector.broadcast %cst_12 : f32 to vector<32x16xf32>
    %37 = vector.extract_strided_slice %21 {offsets = [0, 0], sizes = [32, 1], strides = [1, 1]} : vector<32x3xf32> to vector<32x1xf32>
    %38 = vector.extract_strided_slice %20 {offsets = [0, 1], sizes = [32, 16], strides = [1, 1]} : vector<32x17xf32> to vector<32x16xf32>
    %39 = vector.broadcast %37 : vector<32x1xf32> to vector<32x16xf32>
    %40 = arith.mulf %39, %38 : vector<32x16xf32>
    %41 = arith.addf %36, %40 : vector<32x16xf32>
    %42 = vector.extract_strided_slice %21 {offsets = [0, 2], sizes = [32, 1], strides = [1, 1]} : vector<32x3xf32> to vector<32x1xf32>
    %43 = vector.extract_strided_slice %20 {offsets = [0, 0], sizes = [32, 16], strides = [1, 1]} : vector<32x17xf32> to vector<32x16xf32>
    %44 = vector.broadcast %42 : vector<32x1xf32> to vector<32x16xf32>
    %45 = arith.mulf %44, %43 : vector<32x16xf32>
    %46 = arith.addf %41, %45 : vector<32x16xf32>
    %47 = vector.broadcast %2 : vector<32x1xf32> to vector<32x16xf32>
    %48 = arith.addf %46, %47 : vector<32x16xf32>
    %49 = arith.negf %48 : vector<32x16xf32>
    %50 = math.exp %49 : vector<32x16xf32>
    %cst_13 = arith.constant 1.000000e+00 : f32
    %51 = vector.broadcast %cst_13 : f32 to vector<32x16xf32>
    %52 = arith.addf %51, %50 : vector<32x16xf32>
    %53 = arith.divf %51, %52 : vector<32x16xf32>
    %54 = arith.mulf %48, %53 : vector<32x16xf32>
    %55 = tpu.iota {dimensions = array<i32: 1>} : vector<1x16xi32>
    %c15_i32 = arith.constant 15 : i32
    %56 = vector.broadcast %c15_i32 : i32 to vector<1x16xi32>
    %57 = arith.cmpi slt, %55, %56 : vector<1x16xi32>
    %cst_14 = arith.constant dense<0.000000e+00> : vector<32xf32>
    %58 = vector.multi_reduction <add>, %35, %cst_14 [1] : vector<32x16xf32> to vector<32xf32>
    %59 = vector.shape_cast %58 : vector<32xf32> to vector<32x1xf32>
    %cst_15 = arith.constant 0.000000e+00 : f32
    %60 = vector.shape_cast %57 : vector<1x16xi1> to vector<1x16xi1>
    %61 = vector.broadcast %60 : vector<1x16xi1> to vector<32x16xi1>
    %62 = vector.broadcast %cst_15 : f32 to vector<32x16xf32>
    %63 = arith.select %61, %54, %62 : vector<32x16xi1>, vector<32x16xf32>
    %cst_16 = arith.constant dense<0.000000e+00> : vector<32xf32>
    %64 = vector.multi_reduction <add>, %63, %cst_16 [1] : vector<32x16xf32> to vector<32xf32>
    %65 = vector.shape_cast %64 : vector<32xf32> to vector<32x1xf32>
    %66 = arith.addf %59, %65 : vector<32x1xf32>
    %cst_17 = arith.constant 0.0322580636 : f32
    %67 = vector.broadcast %cst_17 : f32 to vector<32x1xf32>
    %68 = arith.mulf %66, %67 : vector<32x1xf32>
    %c0_18 = arith.constant 0 : index
    %c0_19 = arith.constant 0 : index
    %69 = vector.load %arg4[%c0_18, %c0_19] : memref<8x32xf32, #tpu.memory_space<vmem>>, vector<8x32xf32>
    %cst_20 = arith.constant dense<0.000000e+00> : vector<8x1xf32>
    %70 = tpu.matmul %69, %68, %cst_20 {dimension_numbers = #tpu.dot_dimension_numbers<[1], [0], [0], [1], [0, 0, 1, 1], [], []>} : vector<8x32xf32>, vector<32x1xf32>, vector<8x1xf32> -> vector<8x1xf32>
    %71 = arith.negf %70 : vector<8x1xf32>
    %72 = math.exp %71 : vector<8x1xf32>
    %cst_21 = arith.constant 1.000000e+00 : f32
    %73 = vector.broadcast %cst_21 : f32 to vector<8x1xf32>
    %74 = arith.addf %73, %72 : vector<8x1xf32>
    %75 = arith.divf %73, %74 : vector<8x1xf32>
    %76 = arith.mulf %70, %75 : vector<8x1xf32>
    %c0_22 = arith.constant 0 : index
    %c0_23 = arith.constant 0 : index
    %77 = vector.load %arg5[%c0_22, %c0_23] : memref<32x8xf32, #tpu.memory_space<vmem>>, vector<32x8xf32>
    %cst_24 = arith.constant dense<0.000000e+00> : vector<32x1xf32>
    %78 = tpu.matmul %77, %76, %cst_24 {dimension_numbers = #tpu.dot_dimension_numbers<[1], [0], [0], [1], [0, 0, 1, 1], [], []>} : vector<32x8xf32>, vector<8x1xf32>, vector<32x1xf32> -> vector<32x1xf32>
    %79 = arith.negf %78 : vector<32x1xf32>
    %80 = math.exp %79 : vector<32x1xf32>
    %cst_25 = arith.constant 1.000000e+00 : f32
    %81 = vector.broadcast %cst_25 : f32 to vector<32x1xf32>
    %82 = arith.addf %81, %80 : vector<32x1xf32>
    %83 = arith.divf %81, %82 : vector<32x1xf32>
    %84 = vector.broadcast %83 : vector<32x1xf32> to vector<32x16xf32>
    %85 = arith.mulf %35, %84 : vector<32x16xf32>
    %86 = vector.broadcast %83 : vector<32x1xf32> to vector<32x16xf32>
    %87 = arith.mulf %54, %86 : vector<32x16xf32>
    %88 = tpu.concatenate %85, %87 in 1 : vector<32x16xf32>, vector<32x16xf32> -> vector<32x32xf32>
    %c0_26 = arith.constant 0 : index
    %c0_27 = arith.constant 0 : index
    %89 = vector.load %arg6[%c0_26, %c0_27] : memref<16x32xbf16, #tpu.memory_space<vmem>>, vector<16x32xbf16>
    %90 = arith.truncf %88 : vector<32x32xf32> to vector<32x32xbf16>
    %cst_28 = arith.constant dense<0.000000e+00> : vector<16x32xf32>
    %91 = tpu.matmul %89, %90, %cst_28 {dimension_numbers = #tpu.dot_dimension_numbers<[1], [0], [0], [1], [0, 0, 1, 1], [], []>} : vector<16x32xbf16>, vector<32x32xbf16>, vector<16x32xf32> -> vector<16x32xf32>
    %92 = vector.broadcast %3 : vector<16x1xf32> to vector<16x32xf32>
    %93 = arith.addf %91, %92 : vector<16x32xf32>
    %94 = arith.negf %93 : vector<16x32xf32>
    %95 = math.exp %94 : vector<16x32xf32>
    %cst_29 = arith.constant 1.000000e+00 : f32
    %96 = vector.broadcast %cst_29 : f32 to vector<16x32xf32>
    %97 = arith.addf %96, %95 : vector<16x32xf32>
    %98 = arith.divf %96, %97 : vector<16x32xf32>
    %99 = arith.mulf %93, %98 : vector<16x32xf32>
    %100 = vector.extract_strided_slice %8 {offsets = [0, 1], sizes = [8, 16], strides = [1, 1]} : vector<8x17xf32> to vector<8x16xf32>
    %101 = vector.extract_strided_slice %8 {offsets = [0, 0], sizes = [8, 16], strides = [1, 1]} : vector<8x17xf32> to vector<8x16xf32>
    %102 = tpu.concatenate %100, %101 in 0 : vector<8x16xf32>, vector<8x16xf32> -> vector<16x16xf32>
    %103 = arith.truncf %102 : vector<16x16xf32> to vector<16x16xbf16>
    %c0_30 = arith.constant 0 : index
    %c0_31 = arith.constant 0 : index
    %104 = vector.load %arg7[%c0_30, %c0_31] : memref<32x16xbf16, #tpu.memory_space<vmem>>, vector<32x16xbf16>
    %cst_32 = arith.constant dense<0.000000e+00> : vector<32x16xf32>
    %105 = tpu.matmul %104, %103, %cst_32 {dimension_numbers = #tpu.dot_dimension_numbers<[1], [0], [0], [1], [0, 0, 1, 1], [], []>} : vector<32x16xbf16>, vector<16x16xbf16>, vector<32x16xf32> -> vector<32x16xf32>
    %106 = vector.extract_strided_slice %105 {offsets = [0, 0], sizes = [16, 16], strides = [1, 1]} : vector<32x16xf32> to vector<16x16xf32>
    %107 = vector.broadcast %4 : vector<16x1xf32> to vector<16x16xf32>
    %108 = arith.addf %106, %107 : vector<16x16xf32>
    %109 = arith.negf %108 : vector<16x16xf32>
    %110 = math.exp %109 : vector<16x16xf32>
    %cst_33 = arith.constant 1.000000e+00 : f32
    %111 = vector.broadcast %cst_33 : f32 to vector<16x16xf32>
    %112 = arith.addf %111, %110 : vector<16x16xf32>
    %113 = arith.divf %111, %112 : vector<16x16xf32>
    %114 = arith.mulf %108, %113 : vector<16x16xf32>
    %115 = vector.extract_strided_slice %105 {offsets = [16, 0], sizes = [16, 16], strides = [1, 1]} : vector<32x16xf32> to vector<16x16xf32>
    %116 = vector.broadcast %4 : vector<16x1xf32> to vector<16x16xf32>
    %117 = arith.addf %115, %116 : vector<16x16xf32>
    %118 = arith.negf %117 : vector<16x16xf32>
    %119 = math.exp %118 : vector<16x16xf32>
    %cst_34 = arith.constant 1.000000e+00 : f32
    %120 = vector.broadcast %cst_34 : f32 to vector<16x16xf32>
    %121 = arith.addf %120, %119 : vector<16x16xf32>
    %122 = arith.divf %120, %121 : vector<16x16xf32>
    %123 = arith.mulf %117, %122 : vector<16x16xf32>
    %124 = vector.extract_strided_slice %99 {offsets = [0, 0], sizes = [16, 16], strides = [1, 1]} : vector<16x32xf32> to vector<16x16xf32>
    %125 = arith.addf %124, %114 : vector<16x16xf32>
    %126 = vector.extract_strided_slice %99 {offsets = [0, 16], sizes = [16, 16], strides = [1, 1]} : vector<16x32xf32> to vector<16x16xf32>
    %127 = arith.addf %126, %123 : vector<16x16xf32>
    %cst_35 = arith.constant 0.000000e+00 : f32
    %128 = vector.shape_cast %57 : vector<1x16xi1> to vector<1x16xi1>
    %129 = vector.broadcast %128 : vector<1x16xi1> to vector<16x16xi1>
    %130 = vector.broadcast %cst_35 : f32 to vector<16x16xf32>
    %131 = arith.select %129, %127, %130 : vector<16x16xi1>, vector<16x16xf32>
    %cst_36 = arith.constant 0.000000e+00 : f32
    %132 = vector.broadcast %cst_36 : f32 to vector<16x112xf32>
    %cst_37 = arith.constant 0.000000e+00 : f32
    %133 = vector.broadcast %cst_37 : f32 to vector<16x112xf32>
    %134 = tpu.concatenate %125, %132, %131, %133 in 1 : vector<16x16xf32>, vector<16x112xf32>, vector<16x16xf32>, vector<16x112xf32> -> vector<16x256xf32>
    %c0_38 = arith.constant 0 : index
    %c0_39 = arith.constant 0 : index
    %135 = vector.load %arg9[%c0_38, %c0_39] : memref<16x256xf32, #tpu.memory_space<vmem>>, vector<16x256xf32>
    tpu.vector_store %arg9[%c0_38, %c0_39], %134 {strides = array<i32>} : memref<16x256xf32, #tpu.memory_space<vmem>>, vector<16x256xf32>,
    return
  }
  func.func @transform_0(%arg0: i32) -> (i32, i32) {
    %c0_i32 = arith.constant 0 : i32
    %c0_i32_0 = arith.constant 0 : i32
    return %arg0, %c0_i32 : i32, i32
  }
  func.func @transform_1(%arg0: i32) -> (i32, i32) {
    %c0_i32 = arith.constant 0 : i32
    %c0_i32_0 = arith.constant 0 : i32
    %c0_i32_1 = arith.constant 0 : i32
    return %c0_i32, %c0_i32_0 : i32, i32
  }
  func.func @transform_2(%arg0: i32) -> (i32, i32) {
    %c0_i32 = arith.constant 0 : i32
    %c0_i32_0 = arith.constant 0 : i32
    %c0_i32_1 = arith.constant 0 : i32
    return %c0_i32, %c0_i32_0 : i32, i32
  }
  func.func @transform_3(%arg0: i32) -> (i32, i32) {
    %c0_i32 = arith.constant 0 : i32
    %c0_i32_0 = arith.constant 0 : i32
    %c0_i32_1 = arith.constant 0 : i32
    return %c0_i32, %c0_i32_0 : i32, i32
  }
  func.func @transform_4(%arg0: i32) -> (i32, i32) {
    %c0_i32 = arith.constant 0 : i32
    %c0_i32_0 = arith.constant 0 : i32
    %c0_i32_1 = arith.constant 0 : i32
    return %c0_i32, %c0_i32_0 : i32, i32
  }
  func.func @transform_5(%arg0: i32) -> (i32, i32) {
    %c0_i32 = arith.constant 0 : i32
    %c0_i32_0 = arith.constant 0 : i32
    %c0_i32_1 = arith.constant 0 : i32
    return %c0_i32, %c0_i32_0 : i32, i32
  }
  func.func @transform_6(%arg0: i32) -> (i32, i32) {
    %c0_i32 = arith.constant 0 : i32
    %c0_i32_0 = arith.constant 0 : i32
    %c0_i32_1 = arith.constant 0 : i32
    return %c0_i32, %c0_i32_0 : i32, i32
  }
  func.func @transform_7(%arg0: i32) -> (i32, i32) {
    %c0_i32 = arith.constant 0 : i32
    %c0_i32_0 = arith.constant 0 : i32
    %c0_i32_1 = arith.constant 0 : i32
    return %c0_i32, %c0_i32_0 : i32, i32
  }
  func.func @transform_8(%arg0: i32) -> (i32, i32) {
    %c0_i32 = arith.constant 0 : i32
    %c0_i32_0 = arith.constant 0 : i32
    return %arg0, %c0_i32 : i32, i32
  }
}

</mosaic_0001>

<bundles_post_ra>
// kernel: tpu_custom_call.1
= control target key start
LH: loop header
LB: loop body
LE: loop exit
PB: predicated region body
PF: predicated region fallthrough
CT: control target
= control target key end

     0   :  { %vm88_vm0 = vcmask 1043456   ;;  %vm81_vm1 = vcmask 64512   ;;  %v1156_v5 = vmov 0   ;;  %s1447_s0 = inlined_call_operand.vmem [shape: bf16[8,16], index: 0, kind: input, shape index: {}]   ;;  %s1448_s1 = inlined_call_operand.vmem [shape: bf16[32,8], index: 1, kind: input, shape index: {}]   ;;  %s1449_s2 = inlined_call_operand.vmem [shape: f32[32,3], index: 2, kind: input, shape index: {}]   ;;  %s1450_s3 = inlined_call_operand.vmem [shape: f32[8,32], index: 3, kind: input, shape index: {}]   ;;  %s1451_s4 = inlined_call_operand.vmem [shape: f32[32,8], index: 4, kind: input, shape index: {}]   ;;  %s1452_s5 = inlined_call_operand.vmem [shape: bf16[16,32], index: 5, kind: input, shape index: {}]   ;;  %s1453_s6 = inlined_call_operand.vmem [shape: bf16[32,16], index: 6, kind: input, shape index: {}]   ;;  %s1454_s7 = inlined_call_operand.vmem [shape: f32[96,1], index: 7, kind: input, shape index: {}]   ;;  %s1455_s8 = inlined_call_operand.hbm [shape: f32[16,256], index: 8, kind: output, shape index: {}]  }
   0x1   :  { %v1216_v0 = vld [vmem:[%s1447_s0] sm:$0xf]  ;;  %v1038_v3 = vld [vmem:[%s1448_s1 + $0x8] sm:$0xff]   ;;  %v34_v4 = vld [vmem:[%s1454_s7 + $0x18] sm:$0xff]  ;;  %1017 = vset.pattern.permute.xlu0 %v1156_v5  ;;  %1018 = vset.pattern.permute.xlu1 %v1156_v5 }
   0x2   :  { %v1037_v1 = vld [vmem:[%s1448_s1] sm:$0xff]   ;;  %1004 = vmatprep.subr.msk.bf16.mxu0 %vm88_vm0, %v1216_v0  ;;  %v90_v2 = vsel %vm88_vm0, %v1216_v0, 0  ;;  %v32_v6 = vld [vmem:[%s1454_s7 + $0x8] sm:$0xff]  ;;  %68 = vperm.xlu0 %1017, %v34_v4   ;;  %v33_v7 = vld [vmem:[%s1454_s7 + $0x10] sm:$0xff] }
   0x3   :  { %966 = vmatpush3.bf16.msra.mxu0 %v90_v2  ;;  %967 = vmatprep.mubr.msk.bf16.mxu0 %vm81_vm1, %v1037_v1  ;;  %v31_v8 = vld [vmem:[%s1454_s7] sm:$0xff] }
   0x4   :  { %58 = vperm.xlu1 %1018, %v32_v6  }
   0x6   :  { %968 = vmatmul.mubr.msk.bf16.vlgmr.msra.gmra.mxu0 %vm81_vm1, %v1038_v3 }
   0x7   :  { %13 = vsyncpa [#allocation3], 0  ;;  %63 = vperm.xlu0 %1017, %v33_v7   ;;  %v1245_v9 = vld [vmem:[%s1449_s2 + $0x10] sm:$0xff]  ;;  %v1250_v10 = vld [vmem:[%s1449_s2 + $0x18] sm:$0xff]  ;;  %v1157_v11 = vmov 2   ;;  %v1158_v18 = vmov 1  }
   0x8   :  { %53 = vperm.xlu1 %1018, %v31_v8   ;;  %v1257_v12 = vld [vmem:[%s1449_s2 + $0x8] sm:$0xff]  ;;  %v1262_v13 = vld [vmem:[%s1449_s2] sm:$0xff]  ;;  %v38_v14 = vld [vmem:[%s1454_s7 + $0x38] sm:$0xff]  ;;  %vm45_vm2 = vcmask 130048   ;;  %s1159_s10 = smov 1   ;;  %s1160_s11 = smov 127  }
   0x9   :  { %v36_v15 = vld [vmem:[%s1454_s7 + $0x28] sm:$0xff]  ;;  %v35_v16 = vld [vmem:[%s1454_s7 + $0x20] sm:$0xff]  ;;  %v37_v17 = vld [vmem:[%s1454_s7 + $0x30] sm:$0xff]  ;;  %vm1162_vm4 = vmmov 0   ;;  %vm411_vm5 = vcmask 261120   ;;  %s1163_s20 = smov 15  }
   0xa   :  { %s1165_s30 = smov 112   ;;  %s1166_s9 = smov [#allocation2]  }
   0xb   :  { %1019 = vset.pattern.permute.xlu0 %v1157_v11 }
   0xc   :  { %1020 = vset.pattern.permute.xlu1 %v1157_v11  ;;  %294 = vperm.xlu0 %1019, %v1250_v10  }
   0xd   :  { %290 = vperm.xlu1 %1020, %v1245_v9  }
  0x10   :  { %282 = vperm.xlu0 %1019, %v1262_v13  }
  0x11   :  { %286 = vperm.xlu1 %1020, %v1257_v12  }
  0x14   :  { %1022 = vset.pattern.permute.xlu0 %v1156_v5 }
  0x15   :  { %1021 = vset.pattern.permute.xlu1 %v1156_v5  ;;  %266 = vperm.xlu0 %1022, %v1245_v9  }
  0x16   :  { %270 = vperm.xlu1 %1021, %v1250_v10  }
  0x19   :  { %217 = vperm.xlu0 %1022, %v37_v17  }
  0x1a   :  { %222 = vperm.xlu1 %1021, %v38_v14  }
  0x1d   :  { %1023 = vset.pattern.permute.xlu0 %v1158_v18 }
  0x1e   :  { %262 = vperm.xlu1 %1021, %v1257_v12  }
  0x22   :  { %258 = vperm.xlu1 %1021, %v1262_v13  }
  0x26   :  { %212 = vperm.xlu1 %1021, %v36_v15  }
  0x2a   :  { %207 = vperm.xlu1 %1021, %v35_v16  }
  0x2e   :  { %1024 = vset.pattern.permute.xlu1 %v1158_v18 }
  0x7d   :  { %v69_v19 = vpop.permute.xlu0 %68 }
  0x7f   :  { %v59_v20 = vpop.permute.xlu1 %58 }
  0x82   :  { %v64_v21 = vpop.permute.xlu0 %63 }
  0x83   :  { %v54_v23 = vpop.permute.xlu1 %53 }
  0x87   :  { %v295_v43 = vpop.permute.xlu0 %294 }
  0x88   :  { %v291_v49 = vpop.permute.xlu1 %290 }
  0x8b   :  { %v283_v53 = vpop.permute.xlu0 %282 }
  0x8c   :  { %v287_v61 = vpop.permute.xlu1 %286 }
  0x90   :  { %v267_v4 = vpop.permute.xlu0 %266 }
  0x91   :  { %v271_v63 = vpop.permute.xlu1 %270 }
  0x94   :  { %v218_v7 = vpop.permute.xlu0 %217 }
  0x95   :  { %v223_v1 = vpop.permute.xlu1 %222 }
  0x99   :  { %v263_v2 = vpop.permute.xlu1 %262 }
  0x9d   :  { %v259_v3 = vpop.permute.xlu1 %258 }
  0xa1   :  { %v1304_v6 = vpop.permute.xlu1 %212 }
  0xa5   :  { %v1306_v8 = vpop.permute.xlu1 %207 }
  0xc6   :  { %v969_v22 = vpop.f32.mrf.mxu0 }
  0xc7   :  { %v135_v24 = vadd.f32 %v969_v22, %v64_v21 }
  0xc8   :  { %v126_v25 = vpop.f32.mrf.mxu0 }
  0xc9   :  { %v914_v26 = vmul.f32 -1.442695, %v135_v24  ;;  %v127_v27 = vadd.f32 %v126_v25, %v54_v23 }
  0xca   :  { %v970_v28 = vpop.f32.mrf.mxu0 }
  0xcb   :  { %1042 = vpow2.f32 %v914_v26  ;;  %v912_v29 = vmul.f32 -1.442695, %v127_v27  ;;  %v138_v30 = vadd.f32 %v970_v28, %v69_v19 }
  0xcc   :  { %v129_v31 = vpop.f32.mrf.mxu0 }
  0xcd   :  { %1044 = vpow2.f32 %v912_v29  ;;  %v915_v32 = vmul.f32 -1.442695, %v138_v30  ;;  %v130_v33 = vadd.f32 %v129_v31, %v59_v20 }
  0xcf   :  { %1046 = vpow2.f32 %v915_v32  ;;  %v913_v34 = vmul.f32 -1.442695, %v130_v33 }
  0xd1   :  { %1048 = vpow2.f32 %v913_v34 }
  0xd8   :  { %v1043_v35 = vpop.eup %1042 }
  0xd9   :  { %v155_v36 = vadd.f32 1.0, %v1043_v35 }
  0xda   :  { %v1045_v37 = vpop.eup %1044 }
  0xdb   :  { %1050 = vrcp.f32 %v155_v36  ;;  %v153_v38 = vadd.f32 1.0, %v1045_v37 }
  0xdc   :  { %v1047_v39 = vpop.eup %1046 }
  0xdd   :  { %1052 = vrcp.f32 %v153_v38  ;;  %v156_v40 = vadd.f32 1.0, %v1047_v39 }
  0xde   :  { %v1049_v41 = vpop.eup %1048 }
  0xdf   :  { %1054 = vrcp.f32 %v156_v40  ;;  %v154_v42 = vadd.f32 1.0, %v1049_v41 }
  0xe1   :  { %1056 = vrcp.f32 %v154_v42 }
  0xe8   :  { %v1051_v44 = vpop.eup %1050 }
  0xe9   :  { %v167_v45 = vmul.f32 %v1051_v44, %v135_v24 }
  0xea   :  { %v1053_v46 = vpop.eup %1052 }
  0xeb   :  { %v165_v47 = vmul.f32 %v1053_v46, %v127_v27  ;;  %v171_v48 = vsel %vm45_vm2, %v167_v45, 0.0 }
  0xec   :  { %v1055_v50 = vpop.eup %1054  ;;  %v299_v51 = vmul.f32 %v291_v49, %v171_v48 }
  0xed   :  { %v168_v52 = vmul.f32 %v1055_v50, %v138_v30  ;;  %v1286_v54 = vsel %vm45_vm2, %v165_v47, 0.0 }
  0xee   :  { %v1057_v55 = vpop.eup %1056  ;;  %v297_v56 = vmul.f32 %v283_v53, %v1286_v54  ;;  %309 = vrot.lane.b32.xlu0 %v299_v51, %s1159_s10 }
  0xef   :  { %v166_v57 = vmul.f32 %v1057_v55, %v130_v33  ;;  %v172_v58 = vsel %vm45_vm2, %v168_v52, 0.0 }
  0xf0   :  { %v300_v59 = vmul.f32 %v295_v43, %v172_v58  ;;  %305 = vrot.lane.b32.xlu1 %v297_v56, %s1159_s10  ;;  %v276_v15 = vmul.f32 %v271_v63, %v172_v58 }
  0xf1   :  { %v1293_v60 = vsel %vm45_vm2, %v166_v57, 0.0 }
  0xf2   :  { %311 = vrot.lane.b32.xlu0 %v300_v59, %s1159_s10  ;;  %v298_v62 = vmul.f32 %v287_v61, %v1293_v60  ;;  %v274_v20 = vmul.f32 %v263_v2, %v1293_v60 }
  0xf4   :  { %189 = vperm.xlu1 %1024, %v1245_v9   ;;  %v275_v9 = vmul.f32 %v267_v4, %v171_v48 }
  0xf6   :  { %307 = vrot.lane.b32.xlu0 %v298_v62, %s1159_s10 }
  0xf8   :  { %184 = vperm.xlu1 %1024, %v1257_v12  }
  0xfa   :  { %194 = vperm.xlu0 %1023, %v1250_v10   ;;  %v273_v10 = vmul.f32 %v259_v3, %v1286_v54 }
  0xfc   :  { %1026 = vset.pattern.permute.xlu1 %v1156_v5 }
  0xfe   :  { %179 = vperm.xlu0 %1023, %v1262_v13  }
 0x102   :  { %1025 = vset.pattern.permute.xlu0 %v1156_v5 }
 0x160   :  { %v310_v11 = vpop.permute.xlu0 %309 }
 0x161   :  { %v319_v12 = vadd.f32 %v310_v11, %v275_v9 }
 0x162   :  { %v306_v14 = vpop.permute.xlu1 %305 }
 0x163   :  { %v323_v13 = vadd.f32 %v319_v12, %v218_v7  ;;  %v317_v16 = vadd.f32 %v306_v14, %v273_v10 }
 0x164   :  { %v312_v5 = vpop.permute.xlu0 %311 }
 0x165   :  { %v922_v17 = vmul.f32 -1.442695, %v323_v13  ;;  %v321_v18 = vadd.f32 %v317_v16, %v1306_v8  ;;  %v320_v19 = vadd.f32 %v312_v5, %v276_v15  ;;  %v353_v16 = vlaneseq }
 0x167   :  { %1058 = vpow2.f32 %v922_v17  ;;  %v920_v21 = vmul.f32 -1.442695, %v321_v18  ;;  %v324_v22 = vadd.f32 %v320_v19, %v223_v1  ;;  %v1340_v5 = vand.u32 127, %v353_v16 }
 0x168   :  { %v308_v23 = vpop.permute.xlu0 %307 }
 0x169   :  { %1060 = vpow2.f32 %v920_v21  ;;  %v923_v24 = vmul.f32 -1.442695, %v324_v22  ;;  %v318_v25 = vadd.f32 %v308_v23, %v274_v20  ;;  %vm355_vm3 = vcmp.lt.s32.totalorder %v1340_v5, 15 }
 0x16b   :  { %1062 = vpow2.f32 %v923_v24  ;;  %v322_v26 = vadd.f32 %v318_v25, %v1304_v6 }
 0x16d   :  { %v921_v27 = vmul.f32 -1.442695, %v322_v26 }
 0x16f   :  { %1064 = vpow2.f32 %v921_v27  ;;  %v190_v28 = vpop.permute.xlu1 %189 }
 0x170   :  { %v199_v31 = vmul.f32 %v190_v28, %v171_v48 }
 0x172   :  { %v227_v36 = vadd.f32 %v218_v7, %v199_v31  ;;  %v1161_v31 = vmov 0.0  }
 0x173   :  { %971 = vmatprep.subr.mxu1 %v1161_v31  ;;  %979 = vmatprep.mubr.msk.f32.mxu1 %vm1162_vm4, %v1161_v31 }
 0x174   :  { %v1059_v29 = vpop.eup %1058  ;;  %v918_v40 = vmul.f32 -1.442695, %v227_v36 }
 0x175   :  { %v339_v30 = vadd.f32 1.0, %v1059_v29  ;;  %v195_v37 = vpop.permute.xlu0 %194 }
 0x176   :  { %v1061_v32 = vpop.eup %1060  ;;  %v200_v41 = vmul.f32 %v195_v37, %v172_v58 }
 0x177   :  { %1066 = vrcp.f32 %v339_v30  ;;  %v337_v33 = vadd.f32 1.0, %v1061_v32 }
 0x178   :  { %v1063_v34 = vpop.eup %1062  ;;  %v228_v42 = vadd.f32 %v223_v1, %v200_v41  ;;  %v185_v1 = vpop.permute.xlu1 %184 }
 0x179   :  { %1068 = vrcp.f32 %v337_v33  ;;  %v340_v35 = vadd.f32 1.0, %v1063_v34  ;;  %v198_v2 = vmul.f32 %v185_v1, %v1293_v60  ;;  %v180_v3 = vpop.permute.xlu0 %179 }
 0x17a   :  { %v919_v46 = vmul.f32 -1.442695, %v228_v42  ;;  %v197_v7 = vmul.f32 %v180_v3, %v1286_v54 }
 0x17b   :  { %1070 = vrcp.f32 %v340_v35  ;;  %v226_v4 = vadd.f32 %v1304_v6, %v198_v2 }
 0x17c   :  { %v1065_v38 = vpop.eup %1064  ;;  %v225_v11 = vadd.f32 %v1306_v8, %v197_v7  ;;  %v495_v7 = vld [vmem:[%s1451_s4 + $0x18] sm:$0xff] }
 0x17d   :  { %v338_v39 = vadd.f32 1.0, %v1065_v38  ;;  %v917_v9 = vmul.f32 -1.442695, %v226_v4 }
 0x17e   :  { %v916_v10 = vmul.f32 -1.442695, %v225_v11 }
 0x17f   :  { %1072 = vrcp.f32 %v338_v39 }
 0x180   :  { %1074 = vpow2.f32 %v918_v40 }
 0x181   :  { %1076 = vpow2.f32 %v919_v46 }
 0x184   :  { %v1067_v43 = vpop.eup %1066 }
 0x185   :  { %v1312_v44 = vmul.f32 %v1067_v43, %v323_v13 }
 0x186   :  { %v1069_v45 = vpop.eup %1068 }
 0x187   :  { %378 = vrot.lane.b32.xlu0 %v1312_v44, %s1160_s11  ;;  %v1318_v49 = vmul.f32 %v1069_v45, %v321_v18 }
 0x188   :  { %v1071_v47 = vpop.eup %1070 }
 0x189   :  { %v1316_v48 = vmul.f32 %v1071_v47, %v324_v22 }
 0x18b   :  { %380 = vrot.lane.b32.xlu1 %v1316_v48, %s1160_s11  ;;  %374 = vrot.lane.b32.xlu0 %v1318_v49, %s1160_s11 }
 0x18c   :  { %v1073_v50 = vpop.eup %1072 }
 0x18d   :  { %v1324_v51 = vmul.f32 %v1073_v50, %v322_v26  ;;  %v1075_v52 = vpop.eup %1074 }
 0x18e   :  { %v243_v53 = vadd.f32 1.0, %v1075_v52  ;;  %v1077_v55 = vpop.eup %1076  ;;  %v410_v52 = vld [vmem:[%s1450_s3] sm:$0xff] }
 0x18f   :  { %376 = vrot.lane.b32.xlu1 %v1324_v51, %s1160_s11  ;;  %v244_v56 = vadd.f32 1.0, %v1077_v55  ;;  %v44_v55 = vunpack.c.l.bf16 %v1216_v0  ;;  %v494_v0 = vld [vmem:[%s1451_s4 + $0x10] sm:$0xff] }
 0x190   :  { %1078 = vrcp.f32 %v243_v53  ;;  %v492_v53 = vld [vmem:[%s1451_s4] sm:$0xff] }
 0x191   :  { %1080 = vrcp.f32 %v244_v56  ;;  %984 = vmatprep.mubr.msk.f32.mxu0 %vm81_vm1, %v492_v53  ;;  %v46_v56 = vsel %vm45_vm2, %v44_v55, 0.0 }
 0x192   :  { %1082 = vpow2.f32 %v917_v9 }
 0x193   :  { %1084 = vpow2.f32 %v916_v10 }
 0x19d   :  { %v1079_v57 = vpop.eup %1078 }
 0x19e   :  { %v1328_v58 = vmul.f32 %v1079_v57, %v227_v36  ;;  %v1081_v61 = vpop.eup %1080 }
 0x19f   :  { %v1332_v62 = vmul.f32 %v1081_v61, %v228_v42  ;;  %v1083_v12 = vpop.eup %1082 }
 0x1a0   :  { %v362_v59 = vsel %vm45_vm2, %v1328_v58, 0.0  ;;  %v242_v14 = vadd.f32 1.0, %v1083_v12  ;;  %v1085_v15 = vpop.eup %1084 }
 0x1a1   :  { %v365_v63 = vsel %vm45_vm2, %v1332_v62, 0.0  ;;  %v241_v13 = vadd.f32 1.0, %v1085_v15 }
 0x1a2   :  { %1086 = vrcp.f32 %v242_v14 }
 0x1a3   :  { %1088 = vrcp.f32 %v241_v13 }
 0x1aa   :  { %363 = vadd.xlane.f32.xlu0 %v362_v59 }
 0x1af   :  { %v1087_v8 = vpop.eup %1086 }
 0x1b0   :  { %v1349_v20 = vmul.f32 %v1087_v8, %v226_v4  ;;  %v1089_v21 = vpop.eup %1088  ;;  %v493_v4 = vld [vmem:[%s1451_s4 + $0x8] sm:$0xff] }
 0x1b1   :  { %v1356_v27 = vmul.f32 %v1089_v21, %v225_v11 }
 0x1b2   :  { %v359_v25 = vsel %vm45_vm2, %v1349_v20, 0.0 }
 0x1b3   :  { %366 = vadd.xlane.f32.xlu1 %v365_v63  ;;  %v356_v29 = vsel %vm45_vm2, %v1356_v27, 0.0 }
 0x1f9   :  { %v379_v60 = vpop.permute.xlu0 %378 }
 0x1fa   :  { %v388_v54 = vsel %vm355_vm3, %v379_v60, 0.0 }
 0x1fb   :  { %v396_v6 = vsel %vm45_vm2, %v388_v54, 0.0 }
 0x1fc   :  { %397 = vadd.xlane.f32.xlu1 %v396_v6 }
 0x1fd   :  { %v381_v17 = vpop.permute.xlu1 %380  ;;  %v375_v22 = vpop.permute.xlu0 %374 }
 0x1fe   :  { %v389_v18 = vsel %vm355_vm3, %v381_v17, 0.0  ;;  %v386_v28 = vsel %vm355_vm3, %v375_v22, 0.0 }
 0x1ff   :  { %v399_v19 = vsel %vm45_vm2, %v389_v18, 0.0  ;;  %v390_v30 = vsel %vm45_vm2, %v386_v28, 0.0 }
 0x200   :  { %400 = vadd.xlane.f32.xlu0 %v399_v19 }
 0x201   :  { %v377_v23 = vpop.permute.xlu1 %376 }
 0x202   :  { %v387_v24 = vsel %vm355_vm3, %v377_v23, 0.0 }
 0x203   :  { %v393_v26 = vsel %vm45_vm2, %v387_v24, 0.0 }
 0x204   :  { %360 = vadd.xlane.f32.xlu0 %v359_v25  ;;  %394 = vadd.xlane.f32.xlu1 %v393_v26 }
 0x208   :  { %357 = vadd.xlane.f32.xlu0 %v356_v29  ;;  %391 = vadd.xlane.f32.xlu1 %v390_v30  ;;  %v1039_v29 = vld [vmem:[%s1453_s6] sm:$0xff]  }
 0x21e   :  { %743 = vrot.lane.b32.xlu0 %v46_v56, %s1159_s10  ;;  %s897_s10 = sshll.u32 %s1166_s9, 4  ;;  %s898_s10 = int_to_ptr.vmem [resolvable:$true] %s897_s10 }
 0x21f   :  { %p1139_p1 = scmp.lt.s32.totalorder %s898_s10, %s898_s10 }
 0x233   :  { %v364_v33 = vpop.xlane.xlu0 %363 }
 0x23c   :  { %v367_v32 = vpop.xlane.xlu1 %366 }
 0x285   :  { %v398_v34 = vpop.xlane.xlu1 %397 }
 0x286   :  { %v404_v36 = vadd.f32 %v398_v34, %v364_v33 }
 0x288   :  { %v408_v41 = vmul.f32 0.032258064, %v404_v36 }
 0x289   :  { %v401_v35 = vpop.xlane.xlu0 %400 }
 0x28a   :  { %v405_v37 = vadd.f32 %v401_v35, %v367_v32 }
 0x28c   :  { %v409_v38 = vmul.f32 0.032258064, %v405_v37 }
 0x28d   :  { %v361_v39 = vpop.xlane.xlu0 %360  ;;  %v395_v40 = vpop.xlane.xlu1 %394 }
 0x28e   :  { %v403_v42 = vadd.f32 %v395_v40, %v361_v39  ;;  %972 = vmatpush3.msra.mxu1 %v409_v38  ;;  %v41_v40 = vld [vmem:[%s1454_s7 + $0x50] sm:$0xff] }
 0x28f   :  { %973 = vmatprep.subr.mxu1 %v1161_v31 }
 0x290   :  { %v407_v43 = vmul.f32 0.032258064, %v403_v42  ;;  %974 = vmatpush3.msra.mxu1 %v408_v41 }
 0x291   :  { %v358_v45 = vpop.xlane.xlu0 %357  ;;  %975 = vmatprep.subr.mxu1 %v1161_v31  ;;  %v392_v46 = vpop.xlane.xlu1 %391 }
 0x292   :  { %v402_v47 = vadd.f32 %v392_v46, %v358_v45  ;;  %976 = vmatpush3.msra.mxu1 %v407_v43 }
 0x293   :  { %977 = vmatprep.subr.mxu1 %v1161_v31 }
 0x294   :  { %v406_v50 = vmul.f32 0.032258064, %v402_v47 }
 0x295   :  { %v744_v25 = vpop.permute.xlu0 %743 }
 0x296   :  { %978 = vmatpush3.msra.mxu1 %v406_v50  ;;  %v746_v28 = vpack.c.bf16 %v744_v25, %v46_v56 }
 0x297   :  { %980 = vmatmul.mubr.msk.f32.vlgmr.msra.gmra.mxu1 %vm411_vm5, %v410_v52  ;;  %990 = vmatprep.subr.bf16.mxu1 %v1161_v31 }
 0x298   :  { %994 = vmatprep.mubr.msk.bf16.mxu1 %vm1162_vm4, %v1161_v31 }
 0x357   :  { %v481_v57 = vpop.f32.mrf.mxu1 }
 0x358   :  { %v925_v59 = vmul.f32 -1.442695, %v481_v57 }
 0x359   :  { %v981_v61 = vpop.f32.mrf.mxu1 }
 0x35a   :  { %1090 = vpow2.f32 %v925_v59 }
 0x367   :  { %v1091_v63 = vpop.eup %1090 }
 0x368   :  { %v488_v1 = vadd.f32 1.0, %v1091_v63 }
 0x36a   :  { %1092 = vrcp.f32 %v488_v1 }
 0x377   :  { %v1093_v2 = vpop.eup %1092 }
 0x378   :  { %v491_v3 = vmul.f32 %v1093_v2, %v481_v57  ;;  %v1041_v2 = vld [vmem:[%s1452_s5] sm:$0xff]   ;;  %s1164_s5 = smov 16  }
 0x37a   :  { %982 = vmatprep.subr.mxu0 %v491_v3 }
 0x37b   :  { %983 = vmatpush3.msra.mxu0 %v491_v3 }
 0x37c   :  { %985 = vmatmul.mubr.msk.f32.vlgmr.msra.gmra.mxu0 %vm81_vm1, %v493_v4 }
 0x37d   :  { %987 = vmatprep.mubr.msk.f32.mxu0 %vm81_vm1, %v494_v0 }
 0x380   :  { %988 = vmatmul.mubr.msk.f32.gmra.mxu0 %vm81_vm1, %v495_v7 }
 0x381   :  { %1000 = vmatprep.mubr.msk.bf16.mxu0 %vm45_vm2, %v1039_v29 }
 0x43c   :  { %v986_v9 = vpop.f32.mrf.mxu0 }
 0x43d   :  { %v931_v13 = vmul.f32 -1.442695, %v986_v9 }
 0x43e   :  { %v574_v11 = vpop.f32.mrf.mxu0 }
 0x43f   :  { %v930_v10 = vmul.f32 -1.442695, %v574_v11 }
 0x440   :  { %v989_v12 = vpop.f32.mrf.mxu0 }
 0x441   :  { %1094 = vpow2.f32 %v930_v10  ;;  %v933_v14 = vmul.f32 -1.442695, %v989_v12 }
 0x442   :  { %v584_v15 = vpop.f32.mrf.mxu0 }
 0x443   :  { %1096 = vpow2.f32 %v933_v14  ;;  %v932_v16 = vmul.f32 -1.442695, %v584_v15 }
 0x445   :  { %1098 = vpow2.f32 %v932_v16 }
 0x446   :  { %1100 = vpow2.f32 %v931_v13 }
 0x44e   :  { %v1095_v60 = vpop.eup %1094 }
 0x44f   :  { %v605_v54 = vadd.f32 1.0, %v1095_v60 }
 0x450   :  { %v1097_v6 = vpop.eup %1096 }
 0x451   :  { %1102 = vrcp.f32 %v605_v54  ;;  %v608_v8 = vadd.f32 1.0, %v1097_v6 }
 0x452   :  { %v1099_v17 = vpop.eup %1098 }
 0x453   :  { %1104 = vrcp.f32 %v608_v8  ;;  %v607_v18 = vadd.f32 1.0, %v1099_v17  ;;  %v1101_v19 = vpop.eup %1100 }
 0x454   :  { %v606_v21 = vadd.f32 1.0, %v1101_v19 }
 0x455   :  { %1106 = vrcp.f32 %v607_v18 }
 0x456   :  { %1108 = vrcp.f32 %v606_v21 }
 0x45e   :  { %v1103_v22 = vpop.eup %1102 }
 0x45f   :  { %619 = vperm.xlu0 %1025, %v1103_v22  }
 0x460   :  { %v1105_v23 = vpop.eup %1104 }
 0x461   :  { %634 = vperm.xlu1 %1026, %v1105_v23  }
 0x462   :  { %v1107_v24 = vpop.eup %1106 }
 0x463   :  { %v1109_v26 = vpop.eup %1108 }
 0x465   :  { %629 = vperm.xlu1 %1026, %v1107_v24  }
 0x469   :  { %624 = vperm.xlu1 %1026, %v1109_v26  }
 0x46d   :  { %762 = vrot.lane.b32.xlu1 %v746_v28, %s1160_s11  ;;  %s1134_s11 = scalar_lea.vmem %s898_s10, 512 }
 0x46e   :  { %p1135_p0 = scmp.ne.s32.totalorder %s898_s10, %s1134_s11  ;;  %p1140_p2 = scmp.lt.s32.totalorder %s1134_s11, %s1134_s11 }
 0x470   :  { %p1141_p3 = por %p1140_p2, %p1139_p1 }
 0x472   :  { %p1142_p4 = pnand %p1141_p3, %p1135_p0 }
 0x4da   :  { %v620_v35 = vpop.permute.xlu0 %619 }
 0x4db   :  { %v641_v38 = vmul.f32 %v620_v35, %v1318_v49  ;;  %v1040_v49 = vld [vmem:[%s1453_s6 + $0x8] sm:$0xff]   ;;  %v637_v57 = vmul.f32 %v620_v35, %v1356_v27 }
 0x4dc   :  { %v635_v30 = vpop.permute.xlu1 %634 }
 0x4dd   :  { %v644_v33 = vmul.f32 %v635_v30, %v1316_v48  ;;  %v42_v48 = vld [vmem:[%s1454_s7 + $0x58] sm:$0xff]  ;;  %v640_v45 = vmul.f32 %v635_v30, %v1332_v62 }
 0x4e0   :  { %v630_v32 = vpop.permute.xlu1 %629 }
 0x4e1   :  { %v643_v34 = vmul.f32 %v630_v32, %v1312_v44  ;;  %v39_v44 = vld [vmem:[%s1454_s7 + $0x40] sm:$0xff]  ;;  %v639_v46 = vmul.f32 %v630_v32, %v1328_v58 }
 0x4e3   :  { %v1027_v36 = vpack.i.bf16 %v644_v33, %v643_v34 }
 0x4e4   :  { %v625_v37 = vpop.permute.xlu1 %624 }
 0x4e5   :  { %v642_v39 = vmul.f32 %v625_v37, %v1324_v51  ;;  %1028 = vrot.lane.b32.xlu0 %v1027_v36, %s1163_s20  ;;  %v40_v51 = vld [vmem:[%s1454_s7 + $0x48] sm:$0xff]  ;;  %v638_v59 = vmul.f32 %v625_v37, %v1349_v20 }
 0x4e7   :  { %v1032_v41 = vpack.i.bf16 %v642_v39, %v641_v38 }
 0x4e8   :  { %v763_v42 = vpop.permute.xlu1 %762 }
 0x4e9   :  { %822 = vperm.xlu0 %1025, %v41_v40   ;;  %1033 = vrot.lane.b32.xlu1 %v1032_v41, %s1163_s20 }
 0x4ea   :  { %998 = vmatprep.subr.bf16.mxu0 %v763_v42 }
 0x4eb   :  { %999 = vmatpush3.bf16.msra.mxu0 %v763_v42 }
 0x4ed   :  { %671 = vperm.xlu0 %1025, %v39_v44   ;;  %827 = vperm.xlu1 %1026, %v42_v48  }
 0x4ee   :  { %1001 = vmatmul.mubr.msk.bf16.vlgmr.msra.gmra.mxu0 %vm45_vm2, %v1040_v49 }
 0x4f1   :  { %676 = vperm.xlu1 %1026, %v40_v51  }
 0x557   :  { %v1029_v43 = vpop.permute.xlu0 %1028 }
 0x558   :  { %v1031_v47 = vunpack.i.h.bf16 %v1029_v43  ;;  %v1030_v50 = vunpack.i.l.bf16 %v1029_v43 }
 0x55a   :  { %v664_v52 = vsel %vm45_vm2, %v640_v45, %v1031_v47  ;;  %v663_v53 = vsel %vm45_vm2, %v639_v46, %v1030_v50 }
 0x55b   :  { %v668_v55 = vpack.c.bf16 %v664_v52, %v663_v53  ;;  %v1034_v56 = vpop.permute.xlu1 %1033 }
 0x55c   :  { %v1036_v61 = vunpack.i.h.bf16 %v1034_v56  ;;  %v1035_v63 = vunpack.i.l.bf16 %v1034_v56 }
 0x55d   :  { %991 = vmatpush3.bf16.msra.mxu1 %v668_v55 }
 0x55e   :  { %v662_v1 = vsel %vm45_vm2, %v638_v59, %v1036_v61  ;;  %v661_v62 = vsel %vm45_vm2, %v637_v57, %v1035_v63  ;;  %992 = vmatprep.subr.bf16.mxu1 %v1161_v31 }
 0x55f   :  { %v667_v58 = vpack.c.bf16 %v662_v1, %v661_v62 }
 0x561   :  { %993 = vmatpush3.bf16.msra.mxu1 %v667_v58 }
 0x564   :  { %995 = vmatmul.mubr.msk.bf16.vlgmr.msra.gmra.mxu1 %vm411_vm5, %v1041_v2  ;;  %v823_v27 = vpop.permute.xlu0 %822 }
 0x568   :  { %v828_v7 = vpop.permute.xlu1 %827  ;;  %v672_v21 = vpop.permute.xlu0 %671 }
 0x56c   :  { %v677_v26 = vpop.permute.xlu1 %676 }
 0x5ae   :  { %v1002_v3 = vpop.f32.mrf.mxu0 }
 0x5af   :  { %v846_v20 = vadd.f32 %v1002_v3, %v823_v27 }
 0x5b0   :  { %v805_v4 = vpop.f32.mrf.mxu0 }
 0x5b1   :  { %v944_v0 = vmul.f32 -1.442695, %v846_v20  ;;  %v830_v6 = vadd.f32 %v823_v27, %v805_v4 }
 0x5b2   :  { %v1003_v9 = vpop.f32.mrf.mxu0 }
 0x5b3   :  { %1110 = vpow2.f32 %v944_v0  ;;  %v847_v11 = vadd.f32 %v1003_v9, %v828_v7  ;;  %v942_v17 = vmul.f32 -1.442695, %v830_v6 }
 0x5b4   :  { %v808_v8 = vpop.f32.mrf.mxu0 }
 0x5b5   :  { %v945_v10 = vmul.f32 -1.442695, %v847_v11  ;;  %v831_v18 = vadd.f32 %v828_v7, %v808_v8 }
 0x5b7   :  { %1112 = vpow2.f32 %v945_v10  ;;  %v943_v19 = vmul.f32 -1.442695, %v831_v18 }
 0x5c0   :  { %v1111_v31 = vpop.eup %1110 }
 0x5c1   :  { %v854_v12 = vadd.f32 1.0, %v1111_v31 }
 0x5c3   :  { %1114 = vrcp.f32 %v854_v12 }
 0x5c4   :  { %v1113_v14 = vpop.eup %1112 }
 0x5c5   :  { %v855_v15 = vadd.f32 1.0, %v1113_v14 }
 0x5c7   :  { %1116 = vrcp.f32 %v855_v15 }
 0x5c8   :  { %1118 = vpow2.f32 %v942_v17 }
 0x5c9   :  { %1120 = vpow2.f32 %v943_v19 }
 0x5d0   :  { %v1115_v13 = vpop.eup %1114 }
 0x5d1   :  { %v860_v16 = vmul.f32 %v1115_v13, %v846_v20 }
 0x5d3   :  { %866 = vrot.lane.b32.xlu0 %v860_v16, %s1164_s5 }
 0x5d4   :  { %v1117_v60 = vpop.eup %1116 }
 0x5d5   :  { %v861_v54 = vmul.f32 %v1117_v60, %v847_v11  ;;  %v1119_v33 = vpop.eup %1118 }
 0x5d6   :  { %v838_v34 = vadd.f32 1.0, %v1119_v33  ;;  %v1121_v35 = vpop.eup %1120 }
 0x5d7   :  { %868 = vrot.lane.b32.xlu1 %v861_v54, %s1164_s5  ;;  %v839_v37 = vadd.f32 1.0, %v1121_v35 }
 0x624   :  { %v721_v22 = vpop.f32.mrf.mxu1 }
 0x625   :  { %v722_v23 = vadd.f32 %v721_v22, %v672_v21 }
 0x626   :  { %v996_v24 = vpop.f32.mrf.mxu1 }
 0x627   :  { %v936_v25 = vmul.f32 -1.442695, %v722_v23 }
 0x628   :  { %v724_v28 = vpop.f32.mrf.mxu1 }
 0x629   :  { %1122 = vpow2.f32 %v936_v25  ;;  %v725_v29 = vadd.f32 %v724_v28, %v677_v26 }
 0x62a   :  { %v997_v30 = vpop.f32.mrf.mxu1 }
 0x62b   :  { %v937_v32 = vmul.f32 -1.442695, %v725_v29 }
 0x62d   :  { %1124 = vpow2.f32 %v937_v32 }
 0x62e   :  { %1126 = vrcp.f32 %v838_v34 }
 0x636   :  { %v1123_v36 = vpop.eup %1122 }
 0x637   :  { %v734_v38 = vadd.f32 1.0, %v1123_v36 }
 0x639   :  { %1128 = vrcp.f32 %v734_v38 }
 0x63a   :  { %v1125_v39 = vpop.eup %1124  ;;  %1130 = vrcp.f32 %v839_v37 }
 0x63b   :  { %v735_v40 = vadd.f32 1.0, %v1125_v39  ;;  %v1127_v41 = vpop.eup %1126 }
 0x63c   :  { %v844_v44 = vmul.f32 %v1127_v41, %v830_v6 }
 0x63d   :  { %1132 = vrcp.f32 %v735_v40 }
 0x645   :  { %v867_v51 = vpop.permute.xlu0 %866 }
 0x646   :  { %v1129_v42 = vpop.eup %1128 }
 0x647   :  { %v740_v48 = vmul.f32 %v1129_v42, %v722_v23  ;;  %v1131_v49 = vpop.eup %1130 }
 0x648   :  { %v845_v47 = vmul.f32 %v1131_v49, %v831_v18 }
 0x649   :  { %v862_v43 = vadd.f32 %v844_v44, %v740_v48  ;;  %v872_v45 = vadd.f32 %v867_v51, %v740_v48  ;;  %v869_v53 = vpop.permute.xlu1 %868 }
 0x64a   :  { %v1133_v46 = vpop.eup %1132 }
 0x64b   :  { %v884_v50 = vsel %vm45_vm2, %v862_v43, 0.0  ;;  %v741_v52 = vmul.f32 %v1133_v46, %v725_v29  ;;  %876 = vrot.lane.b32.xlu0 %v872_v45, %s1165_s30 }
 0x64c   :  { %888 = vst [vmem:[#allocation2] sm:$0xff] %v884_v50 }
 0x64d   :  { %v863_v55 = vadd.f32 %v845_v47, %v741_v52  ;;  %v873_v56 = vadd.f32 %v869_v53, %v741_v52 }
 0x64f   :  { %v885_v57 = vsel %vm45_vm2, %v863_v55, 0.0  ;;  %878 = vrot.lane.b32.xlu1 %v873_v56, %s1165_s30 }
 0x650   :  { %890 = vst [vmem:[#allocation2 + $0x10] sm:$0xff] %v885_v57 }
 0x6bd   :  { %v877_v59 = vpop.permute.xlu0 %876 }
 0x6be   :  { %v882_v61 = vsel %vm355_vm3, %v877_v59, 0.0 }
 0x6bf   :  { %v886_v63 = vsel %vm45_vm2, %v882_v61, 0.0 }
 0x6c0   :  { %889 = vst [vmem:[#allocation2 + $0x8] sm:$0xff] %v886_v63 }
 0x6c1   :  { %v879_v1 = vpop.permute.xlu1 %878 }
 0x6c2   :  { %v883_v62 = vsel %vm355_vm3, %v879_v1, 0.0 }
 0x6c3   :  { %v887_v58 = vsel %vm45_vm2, %v883_v62, 0.0 }
 0x6c4   :  { %891 = vst [vmem:[#allocation2 + $0x18] sm:$0xff] %v887_v58 }
 0x6c5   :  { %1145 = shalt.err (!%p1142_p4)
}
 0x6c6   :  { %s1167_s0 = smov 256  }
 0x6c7   :  { %903 = dma.vmem_to_hbm [thread:$0]  %s898_s10, 512, %s1455_s8, [#allocation3], %s1167_s0, %s1167_s0, %s1164_s5  }
 0x6c8   :  { %1154 = dma.done.wait [#allocation3], 512  }
 0x6c9   :  { %1155 = vsyncadd [#allocation3], 4294966784 }
 0x6ca   :  { %907 = vsyncpa [#allocation3], 1 }

</bundles_post_ra>
